<compile_context>
chip_gen: v7x
topology: tpu7x:2x2x1
jax: 0.10.0
libtpu: 0.0.40
codegen_flags: <defaults>
</compile_context>

<pallas_src>
import functools

import jax
import jax.numpy as jnp
from jax import lax
from jax.experimental import pallas as pl
from jax.experimental.pallas import tpu as pltpu

# ---- ROIHeads config (mirrors cfg.MODEL.ROI_HEADS defaults) ----------------
NUM_CLASSES = 16
IOU_THRESHOLDS = (0.3, 0.5)     # Matcher thresholds
IOU_LABELS = (0, -1, 1)         # below/between/above labels
BATCH_SIZE_PER_IMAGE = 64       # used only by the (TODO) random subsampler
POSITIVE_FRACTION = 0.25
PROPOSAL_APPEND_GT = True

P_TILE = 512                    # proposals per grid step (lane width)


def _roi_match_kernel(gt_ref, prop_ref, gtc_ref, out_ref, *,
                      num_classes, thresholds, cls_shift):
    """One (image, proposal-tile): IoU vs all gt, matcher, gt-class labeling."""
    gt = gt_ref[0]            # [G, 4]  f32
    pr = prop_ref[0]          # [4, Pt] f32
    gtc = gtc_ref[0]          # [G, 1]  int32
    num_gt = gt.shape[0]

    gx1 = gt[:, 0:1]; gy1 = gt[:, 1:2]; gx2 = gt[:, 2:3]; gy2 = gt[:, 3:4]   # [G,1]
    px1 = pr[0:1, :]; py1 = pr[1:2, :]; px2 = pr[2:3, :]; py2 = pr[3:4, :]   # [1,Pt]

    iw = jnp.maximum(jnp.minimum(gx2, px2) - jnp.maximum(gx1, px1), 0.0)     # [G,Pt]
    ih = jnp.maximum(jnp.minimum(gy2, py2) - jnp.maximum(gy1, py1), 0.0)     # [G,Pt]
    inter = iw * ih                                                          # [G,Pt]

    area_g = (gx2 - gx1) * (gy2 - gy1)                                       # [G,1]
    area_p = (px2 - px1) * (py2 - py1)                                       # [1,Pt]
    union = area_g + area_p - inter
    union_safe = jnp.where(union > 0.0, union, 1.0)
    # Exact divide (not approx vrcp): keeps bit-parity with the PyTorch Matcher
    # for thresholding at 0.3/0.5 and first-index argmax ties.
    iou = jnp.where(inter > 0.0, inter / union_safe, 0.0)                    # [G,Pt]

    # Matcher: matched_vals = max over gt axis.
    max_v = jnp.max(iou, axis=0, keepdims=True)                              # [1,Pt]

    # Fused (first-)argmax + gt_classes gather via a packed integer key:
    #   key = (gt_index << cls_shift) | (gt_class + 1)
    # min over ties picks the smallest gt index (== jnp.argmax first-index),
    # and the low bits carry that gt's class for free.
    g_iota = lax.broadcasted_iota(jnp.int32, iou.shape, 0)                   # [G,Pt]
    key = (g_iota << cls_shift) | (gtc + 1)                                  # [G,Pt]
    big = jnp.int32(num_gt << cls_shift)                                     # > any valid key
    key_min = jnp.min(jnp.where(iou == max_v, key, big),
                      axis=0, keepdims=True)                                 # [1,Pt]
    midx = key_min >> cls_shift                                              # [1,Pt]
    cls = (key_min & jnp.int32((1 << cls_shift) - 1)) - 1                    # [1,Pt]

    # Threshold labels: [-inf,t0) -> 0, [t0,t1) -> -1, [t1,inf) -> 1
    t0, t1 = thresholds
    lbl = jnp.where(max_v < t0, jnp.int32(IOU_LABELS[0]),
                    jnp.where(max_v < t1, jnp.int32(IOU_LABELS[1]),
                              jnp.int32(IOU_LABELS[2])))                     # [1,Pt]

    cls = jnp.where(lbl == 0, jnp.int32(num_classes), cls)   # background
    cls = jnp.where(lbl == -1, jnp.int32(-1), cls)           # ignore

    # Single lane/sublane-dense writeback slab (matched_vals bitcast f32->i32).
    packed = jnp.concatenate(
        [midx, lbl, cls, pltpu.bitcast(max_v, jnp.int32)], axis=0)           # [4,Pt]
    out_ref[0] = packed


def label_proposals_pallas(gt_boxes, proposal_boxes, gt_classes, *, p_tile=P_TILE):
    """Batched Pallas pairwise_iou + Matcher + gt-class assignment.

    gt_boxes:        [N, G, 4] f32 xyxy
    proposal_boxes:  [N, P, 4] f32 xyxy  (padded internally to a multiple of p_tile)
    gt_classes:      [N, G]    int32
    returns (matched_idxs[N,P], matched_labels[N,P],
             gt_classes_per_prop[N,P], matched_vals[N,P])
    """
    N, G, _ = gt_boxes.shape
    _, P, _ = proposal_boxes.shape

    # Pad proposals to a tile multiple (zero boxes -> IoU 0 -> background; sliced off).
    p_pad = ((P + p_tile - 1) // p_tile) * p_tile
    if p_pad != P:
        pad = jnp.zeros((N, p_pad - P, 4), jnp.float32)
        proposal_boxes = jnp.concatenate([proposal_boxes, pad], axis=1)

    prop_t = jnp.transpose(proposal_boxes, (0, 2, 1))          # [N, 4, p_pad]
    gtc = gt_classes.reshape(N, G, 1).astype(jnp.int32)        # [N, G, 1]

    # Enough low bits to hold (gt_class + 1) in [1, NUM_CLASSES].
    cls_shift = max(1, int(NUM_CLASSES).bit_length())

    kernel = functools.partial(
        _roi_match_kernel, num_classes=NUM_CLASSES,
        thresholds=IOU_THRESHOLDS, cls_shift=cls_shift)

    grid = (N, p_pad // p_tile)   # >= 2 "parallel" steps -> both TCs usable on v7x

    packed = pl.pallas_call(
        kernel,
        out_shape=jax.ShapeDtypeStruct((N, 4, p_pad), jnp.int32),
        grid=grid,
        in_specs=[
            pl.BlockSpec((1, G, 4), lambda n, t: (n, 0, 0)),        # gt boxes (per image)
            pl.BlockSpec((1, 4, p_tile), lambda n, t: (n, 0, t)),   # proposal tile
            pl.BlockSpec((1, G, 1), lambda n, t: (n, 0, 0)),        # gt classes (per image)
        ],
        out_specs=pl.BlockSpec((1, 4, p_tile), lambda n, t: (n, 0, t)),
        compiler_params=pltpu.CompilerParams(
            dimension_semantics=("parallel", "parallel")),
    )(gt_boxes.astype(jnp.float32), prop_t.astype(jnp.float32), gtc)

    midx = packed[:, 0, :P]
    lbl = packed[:, 1, :P]
    cls = packed[:, 2, :P]
    vals = jax.lax.bitcast_convert_type(packed[:, 3, :P], jnp.float32)
    return midx, lbl, cls, vals


# ---- pure-JAX reference (for correctness check only) ------------------------
def _reference(gt_boxes, proposal_boxes, gt_classes):
    gx1, gy1, gx2, gy2 = [gt_boxes[:, i:i + 1] for i in range(4)]
    px1, py1, px2, py2 = [proposal_boxes[:, i][None, :] for i in range(4)]
    iw = jnp.maximum(jnp.minimum(gx2, px2) - jnp.maximum(gx1, px1), 0.0)
    ih = jnp.maximum(jnp.minimum(gy2, py2) - jnp.maximum(gy1, py1), 0.0)
    inter = iw * ih
    area_g = (gx2 - gx1) * (gy2 - gy1)
    area_p = (px2 - px1) * (py2 - py1)
    union = area_g + area_p - inter
    iou = jnp.where(inter > 0, inter / jnp.where(union > 0, union, 1.0), 0.0)
    max_v = iou.max(axis=0)
    midx = jnp.argmax(iou, axis=0).astype(jnp.int32)
    lbl = jnp.where(max_v < IOU_THRESHOLDS[0], 0,
                    jnp.where(max_v < IOU_THRESHOLDS[1], -1, 1)).astype(jnp.int32)
    cls = gt_classes[midx].astype(jnp.int32)
    cls = jnp.where(lbl == 0, NUM_CLASSES, cls)
    cls = jnp.where(lbl == -1, -1, cls)
    return midx, lbl, cls, max_v


def _random_boxes(key, n, img_size=200.0):
    k1, k2, k3, k4 = jax.random.split(key, 4)
    x1 = jax.random.uniform(k1, (n,), minval=0.0, maxval=img_size * 0.6)
    y1 = jax.random.uniform(k2, (n,), minval=0.0, maxval=img_size * 0.6)
    w = jax.random.uniform(k3, (n,), minval=4.0, maxval=img_size * 0.4)
    h = jax.random.uniform(k4, (n,), minval=4.0, maxval=img_size * 0.4)
    return jnp.stack([x1, y1, x1 + w, y1 + h], axis=1).astype(jnp.float32)


if __name__ == "__main__":
    key = jax.random.PRNGKey(0)
    NUM_IMAGES = 2
    G = 8                           # gt boxes per image
    P_TOTAL = 2 * P_TILE            # proposals per image after gt append (= 1024)
    P_RAW = P_TOTAL - G

    gt_list, prop_list, cls_list = [], [], []
    for _ in range(NUM_IMAGES):
        key, kg, kp, kc = jax.random.split(key, 4)
        gt_b = _random_boxes(kg, G)
        pr_b = _random_boxes(kp, P_RAW)
        gt_c = jax.random.randint(kc, (G,), 0, NUM_CLASSES, dtype=jnp.int32)
        if PROPOSAL_APPEND_GT:
            # add_ground_truth_to_proposals (proposal_append_gt=True)
            pr_b = jnp.concatenate([pr_b, gt_b], axis=0)
        gt_list.append(gt_b)
        prop_list.append(pr_b)
        cls_list.append(gt_c)

    gt_boxes = jnp.stack(gt_list)           # [N, G, 4]
    proposal_boxes = jnp.stack(prop_list)   # [N, P, 4]
    gt_classes = jnp.stack(cls_list)        # [N, G]

    # One pallas_call for the whole batch (no per-image launch overhead).
    midx, lbl, cls, vals = label_proposals_pallas(
        gt_boxes, proposal_boxes, gt_classes)
    jax.block_until_ready((midx, lbl, cls, vals))

    r_midx, r_lbl, r_cls, r_vals = jax.vmap(_reference)(
        gt_boxes, proposal_boxes, gt_classes)

    ok = (bool(jnp.all(midx == r_midx)) and bool(jnp.all(lbl == r_lbl))
          and bool(jnp.all(cls == r_cls))
          and bool(jnp.max(jnp.abs(vals - r_vals)) < 1e-5))

    # TODO(synk): subsample_labels (random fg/bg sampling with
    # batch_size_per_image / positive_fraction via torch.randperm) has no clean
    # Pallas equivalent (data-dependent random permutation); the matched/labeled
    # proposals above are the inputs it would consume.
    # TODO(synk): box/mask/keypoint poolers + heads + predictors are external
    # submodules not defined in this spec and are not reimplemented here.

    if ok:
        print("KERNEL_OK")
</pallas_src>

<mosaic_0001>
module attributes {stable_mosaic.version = 11 : i64} {
  func.func @_roi_match_kernel(%arg0: i32, %arg1: i32, %arg2: memref<1x8x4xf32, #tpu.memory_space<vmem>>, %arg3: memref<1x4x512xf32, #tpu.memory_space<vmem>>, %arg4: memref<1x8x1xi32, #tpu.memory_space<vmem>>, %arg5: memref<1x4x512xi32, #tpu.memory_space<vmem>>) attributes {dimension_semantics = [#tpu.dimension_semantics<parallel>, #tpu.dimension_semantics<parallel>], iteration_bounds = array<i64: 2, 2>, scalar_prefetch = 0 : i64, scratch_operands = 0 : i64, tpu.core_type = #tpu.core_type<tc>, window_params = [{transform_indices = @transform_0, window_bounds = array<i64: 1, 8, 4>}, {transform_indices = @transform_1, window_bounds = array<i64: 1, 4, 512>}, {transform_indices = @transform_2, window_bounds = array<i64: 1, 8, 1>}, {transform_indices = @transform_3, window_bounds = array<i64: 1, 4, 512>}]} {
    %c0 = arith.constant 0 : index
    %c0_0 = arith.constant 0 : index
    %c0_1 = arith.constant 0 : index
    %0 = vector.load %arg2[%c0, %c0_0, %c0_1] : memref<1x8x4xf32, #tpu.memory_space<vmem>>, vector<1x8x4xf32>
    %1 = vector.shape_cast %0 : vector<1x8x4xf32> to vector<8x4xf32>
    %c0_2 = arith.constant 0 : index
    %c0_3 = arith.constant 0 : index
    %c0_4 = arith.constant 0 : index
    %2 = vector.load %arg3[%c0_2, %c0_3, %c0_4] : memref<1x4x512xf32, #tpu.memory_space<vmem>>, vector<1x4x512xf32>
    %3 = vector.shape_cast %2 : vector<1x4x512xf32> to vector<4x512xf32>
    %c0_5 = arith.constant 0 : index
    %c0_6 = arith.constant 0 : index
    %c0_7 = arith.constant 0 : index
    %4 = vector.load %arg4[%c0_5, %c0_6, %c0_7] : memref<1x8x1xi32, #tpu.memory_space<vmem>>, vector<1x8x1xi32>
    %5 = vector.shape_cast %4 : vector<1x8x1xi32> to vector<8x1xi32>
    %6 = vector.extract_strided_slice %1 {offsets = [0, 0], sizes = [8, 1], strides = [1, 1]} : vector<8x4xf32> to vector<8x1xf32>
    %7 = vector.extract_strided_slice %1 {offsets = [0, 1], sizes = [8, 1], strides = [1, 1]} : vector<8x4xf32> to vector<8x1xf32>
    %8 = vector.extract_strided_slice %1 {offsets = [0, 2], sizes = [8, 1], strides = [1, 1]} : vector<8x4xf32> to vector<8x1xf32>
    %9 = vector.extract_strided_slice %1 {offsets = [0, 3], sizes = [8, 1], strides = [1, 1]} : vector<8x4xf32> to vector<8x1xf32>
    %10 = vector.extract_strided_slice %3 {offsets = [0, 0], sizes = [1, 512], strides = [1, 1]} : vector<4x512xf32> to vector<1x512xf32>
    %11 = vector.extract_strided_slice %3 {offsets = [1, 0], sizes = [1, 512], strides = [1, 1]} : vector<4x512xf32> to vector<1x512xf32>
    %12 = vector.extract_strided_slice %3 {offsets = [2, 0], sizes = [1, 512], strides = [1, 1]} : vector<4x512xf32> to vector<1x512xf32>
    %13 = vector.extract_strided_slice %3 {offsets = [3, 0], sizes = [1, 512], strides = [1, 1]} : vector<4x512xf32> to vector<1x512xf32>
    %14 = vector.broadcast %8 : vector<8x1xf32> to vector<8x512xf32>
    %15 = vector.broadcast %12 : vector<1x512xf32> to vector<8x512xf32>
    %16 = arith.minimumf %14, %15 : vector<8x512xf32>
    %17 = vector.broadcast %6 : vector<8x1xf32> to vector<8x512xf32>
    %18 = vector.broadcast %10 : vector<1x512xf32> to vector<8x512xf32>
    %19 = arith.maximumf %17, %18 : vector<8x512xf32>
    %20 = arith.subf %16, %19 : vector<8x512xf32>
    %cst = arith.constant 0.000000e+00 : f32
    %21 = vector.broadcast %cst : f32 to vector<8x512xf32>
    %22 = arith.maximumf %20, %21 : vector<8x512xf32>
    %23 = vector.broadcast %9 : vector<8x1xf32> to vector<8x512xf32>
    %24 = vector.broadcast %13 : vector<1x512xf32> to vector<8x512xf32>
    %25 = arith.minimumf %23, %24 : vector<8x512xf32>
    %26 = vector.broadcast %7 : vector<8x1xf32> to vector<8x512xf32>
    %27 = vector.broadcast %11 : vector<1x512xf32> to vector<8x512xf32>
    %28 = arith.maximumf %26, %27 : vector<8x512xf32>
    %29 = arith.subf %25, %28 : vector<8x512xf32>
    %cst_8 = arith.constant 0.000000e+00 : f32
    %30 = vector.broadcast %cst_8 : f32 to vector<8x512xf32>
    %31 = arith.maximumf %29, %30 : vector<8x512xf32>
    %32 = arith.mulf %22, %31 : vector<8x512xf32>
    %33 = arith.subf %8, %6 : vector<8x1xf32>
    %34 = arith.subf %9, %7 : vector<8x1xf32>
    %35 = arith.mulf %33, %34 : vector<8x1xf32>
    %36 = arith.subf %12, %10 : vector<1x512xf32>
    %37 = arith.subf %13, %11 : vector<1x512xf32>
    %38 = arith.mulf %36, %37 : vector<1x512xf32>
    %39 = vector.broadcast %35 : vector<8x1xf32> to vector<8x512xf32>
    %40 = vector.broadcast %38 : vector<1x512xf32> to vector<8x512xf32>
    %41 = arith.addf %39, %40 : vector<8x512xf32>
    %42 = arith.subf %41, %32 : vector<8x512xf32>
    %cst_9 = arith.constant 0.000000e+00 : f32
    %43 = vector.broadcast %cst_9 : f32 to vector<8x512xf32>
    %44 = arith.cmpf ogt, %42, %43 : vector<8x512xf32>
    %cst_10 = arith.constant 1.000000e+00 : f32
    %45 = vector.broadcast %cst_10 : f32 to vector<8x512xf32>
    %46 = arith.select %44, %42, %45 : vector<8x512xi1>, vector<8x512xf32>
    %cst_11 = arith.constant 0.000000e+00 : f32
    %47 = vector.broadcast %cst_11 : f32 to vector<8x512xf32>
    %48 = arith.cmpf ogt, %32, %47 : vector<8x512xf32>
    %49 = arith.divf %32, %46 : vector<8x512xf32>
    %cst_12 = arith.constant 0.000000e+00 : f32
    %50 = vector.broadcast %cst_12 : f32 to vector<8x512xf32>
    %51 = arith.select %48, %49, %50 : vector<8x512xi1>, vector<8x512xf32>
    %cst_13 = arith.constant dense<0xFF800000> : vector<512xf32>
    %52 = vector.multi_reduction <maximumf>, %51, %cst_13 [0] : vector<8x512xf32> to vector<512xf32>
    %53 = vector.shape_cast %52 : vector<512xf32> to vector<1x512xf32>
    %54 = tpu.iota {dimensions = array<i32: 0>} : vector<8x512xi32>
    %c5_i32 = arith.constant 5 : i32
    %55 = vector.broadcast %c5_i32 : i32 to vector<8x512xi32>
    %56 = arith.shli %54, %55 : vector<8x512xi32>
    %c1_i32 = arith.constant 1 : i32
    %57 = vector.broadcast %c1_i32 : i32 to vector<8x1xi32>
    %58 = arith.addi %5, %57 : vector<8x1xi32>
    %59 = vector.broadcast %58 : vector<8x1xi32> to vector<8x512xi32>
    %60 = arith.ori %56, %59 : vector<8x512xi32>
    %61 = vector.broadcast %53 : vector<1x512xf32> to vector<8x512xf32>
    %62 = arith.cmpf oeq, %51, %61 : vector<8x512xf32>
    %c256_i32 = arith.constant 256 : i32
    %63 = vector.broadcast %c256_i32 : i32 to vector<8x512xi32>
    %64 = arith.select %62, %60, %63 : vector<8x512xi1>, vector<8x512xi32>
    %cst_14 = arith.constant dense<2147483647> : vector<512xi32>
    %65 = vector.multi_reduction <minsi>, %64, %cst_14 [0] : vector<8x512xi32> to vector<512xi32>
    %66 = vector.shape_cast %65 : vector<512xi32> to vector<1x512xi32>
    %c5_i32_15 = arith.constant 5 : i32
    %67 = vector.broadcast %c5_i32_15 : i32 to vector<1x512xi32>
    %68 = arith.shrsi %66, %67 : vector<1x512xi32>
    %c31_i32 = arith.constant 31 : i32
    %69 = vector.broadcast %c31_i32 : i32 to vector<1x512xi32>
    %70 = arith.andi %66, %69 : vector<1x512xi32>
    %c1_i32_16 = arith.constant 1 : i32
    %71 = vector.broadcast %c1_i32_16 : i32 to vector<1x512xi32>
    %72 = arith.subi %70, %71 : vector<1x512xi32>
    %cst_17 = arith.constant 3.000000e-01 : f32
    %73 = vector.broadcast %cst_17 : f32 to vector<1x512xf32>
    %74 = arith.cmpf olt, %53, %73 : vector<1x512xf32>
    %cst_18 = arith.constant 5.000000e-01 : f32
    %75 = vector.broadcast %cst_18 : f32 to vector<1x512xf32>
    %76 = arith.cmpf olt, %53, %75 : vector<1x512xf32>
    %c-1_i32 = arith.constant -1 : i32
    %c1_i32_19 = arith.constant 1 : i32
    %77 = vector.broadcast %c-1_i32 : i32 to vector<1x512xi32>
    %78 = vector.broadcast %c1_i32_19 : i32 to vector<1x512xi32>
    %79 = arith.select %76, %77, %78 : vector<1x512xi1>, vector<1x512xi32>
    %c0_i32 = arith.constant 0 : i32
    %80 = vector.broadcast %c0_i32 : i32 to vector<1x512xi32>
    %81 = arith.select %74, %80, %79 : vector<1x512xi1>, vector<1x512xi32>
    %c0_i32_20 = arith.constant 0 : i32
    %82 = vector.broadcast %c0_i32_20 : i32 to vector<1x512xi32>
    %83 = arith.cmpi eq, %81, %82 : vector<1x512xi32>
    %c16_i32 = arith.constant 16 : i32
    %84 = vector.broadcast %c16_i32 : i32 to vector<1x512xi32>
    %85 = arith.select %83, %84, %72 : vector<1x512xi1>, vector<1x512xi32>
    %c-1_i32_21 = arith.constant -1 : i32
    %86 = vector.broadcast %c-1_i32_21 : i32 to vector<1x512xi32>
    %87 = arith.cmpi eq, %81, %86 : vector<1x512xi32>
    %c-1_i32_22 = arith.constant -1 : i32
    %88 = vector.broadcast %c-1_i32_22 : i32 to vector<1x512xi32>
    %89 = arith.select %87, %88, %85 : vector<1x512xi1>, vector<1x512xi32>
    %90 = tpu.bitcast %53 : vector<1x512xf32> -> vector<1x512xi32>
    %91 = tpu.concatenate %68, %81, %89, %90 in 0 : vector<1x512xi32>, vector<1x512xi32>, vector<1x512xi32>, vector<1x512xi32> -> vector<4x512xi32>
    %c0_23 = arith.constant 0 : index
    %c0_24 = arith.constant 0 : index
    %c0_25 = arith.constant 0 : index
    %92 = vector.load %arg5[%c0_23, %c0_24, %c0_25] : memref<1x4x512xi32, #tpu.memory_space<vmem>>, vector<1x4x512xi32>
    %93 = vector.shape_cast %92 : vector<1x4x512xi32> to vector<4x512xi32>
    %94 = vector.shape_cast %91 : vector<4x512xi32> to vector<1x4x512xi32>
    tpu.vector_store %arg5[%c0_23, %c0_24, %c0_25], %94 {strides = array<i32>} : memref<1x4x512xi32, #tpu.memory_space<vmem>>, vector<1x4x512xi32>,
    return
  }
  func.func @transform_0(%arg0: i32, %arg1: i32) -> (i32, i32, i32) {
    %c0_i32 = arith.constant 0 : i32
    %c0_i32_0 = arith.constant 0 : i32
    %c0_i32_1 = arith.constant 0 : i32
    return %arg0, %c0_i32, %c0_i32_0 : i32, i32, i32
  }
  func.func @transform_1(%arg0: i32, %arg1: i32) -> (i32, i32, i32) {
    %c0_i32 = arith.constant 0 : i32
    %c0_i32_0 = arith.constant 0 : i32
    return %arg0, %c0_i32, %arg1 : i32, i32, i32
  }
  func.func @transform_2(%arg0: i32, %arg1: i32) -> (i32, i32, i32) {
    %c0_i32 = arith.constant 0 : i32
    %c0_i32_0 = arith.constant 0 : i32
    %c0_i32_1 = arith.constant 0 : i32
    return %arg0, %c0_i32, %c0_i32_0 : i32, i32, i32
  }
  func.func @transform_3(%arg0: i32, %arg1: i32) -> (i32, i32, i32) {
    %c0_i32 = arith.constant 0 : i32
    %c0_i32_0 = arith.constant 0 : i32
    return %arg0, %c0_i32, %arg1 : i32, i32, i32
  }
}

</mosaic_0001>

<bundles_post_ra>
// kernel: tpu_custom_call.1
= control target key start
LH: loop header
LB: loop body
LE: loop exit
PB: predicated region body
PF: predicated region fallthrough
CT: control target
= control target key end

     0   :  { %8 = vsyncpa [#allocation3], 0  ;;  %s1398_s0 = inlined_call_operand.vmem [shape: f32[2,8,4], index: 0, kind: input, shape index: {}]   ;;  %s1399_s1 = inlined_call_operand.hbm [shape: f32[2,4,1024], index: 1, kind: input, shape index: {}]   ;;  %s1400_s2 = inlined_call_operand.vmem [shape: s32[2,8,1], index: 2, kind: input, shape index: {}]   ;;  %s1401_s3 = inlined_call_operand.hbm [shape: s32[2,4,1024], index: 3, kind: output, shape index: {}]  }
   0x1   :  { %10 = vsyncpa [#allocation3 + $0x1], 0 }
   0x2   :  { %11 = vsyncpa [#allocation4], 0 }
   0x3   :  { %13 = vsyncpa [#allocation4 + $0x1], 0  ;;  %s1096_s12 = smov 0   ;;  %s1098_s13 = smov 0  }
   0x4   :  { %s1100_s14 = smov 0   ;;  %s1102_s15 = smov 0  }
   0x5   :  { %s1104_s16 = smov 0   ;;  %s1106_s17 = smov 0  }
   0x6   :  { %s1108_s18 = smov 0   ;;  %s1110_s19 = smov 0  }
   0x7 LB: > { %s815_s20 = sadd.s32 4294967295, %s1066_s19   ;;  %s816_s21 = sadd.s32 4294967294, %s1066_s19   ;;  %s1066_s19 = sphi %s1110_s19, %s19_s19   ;;  %s1062_s18 = sphi %s1108_s18, %s1418_s18   ;;  %s1058_s17 = sphi %s1106_s17, %s1417_s17   ;;  %s1054_s16 = sphi %s1104_s16, %s1416_s16   ;;  %s1050_s15 = sphi %s1102_s15, %s1415_s15   ;;  %s1046_s14 = sphi %s1100_s14, %s1414_s14   ;;  %s1042_s13 = sphi %s1098_s13, %s1413_s13   ;;  %s1038_s12 = sphi %s1096_s12, %s1412_s12  }
   0x8   : > { %s28_s22 = sadd.s32 1, %s1058_s17  ;;  %s31_s23 = sadd.s32 1, %s1062_s18 }
   0x9   : > { %p29_p0 = scmp.ge.s32.totalorder %s28_s22, 2  ;;  %s66_s24 = sadd.s32 1, %s1046_s14 }
   0xa   : > { %p73_p1 = scmp.ne.s32.totalorder %s1046_s14, %s1042_s13  ;;  %p74_p2 = scmp.eq.s32.totalorder %s1066_s19, 0 }
   0xb   : > { %s1420_s22 = smov (%p29_p0, %s28_s22), 0  ;;  %s1422_s23 = smov (!%p29_p0, %s31_s23), %s1062_s18 }
   0xc   : > { %s62_s25 = ssub.s32 %s1058_s17, %s1420_s22  ;;  %p1149_p3 = por %p74_p2, %p73_p1 }
   0xd   : > { %p33_p4 = scmp.ge.s32.totalorder %s1422_s23, 2  ;;  %p79_p5 = scmp.ne.s32.totalorder %s1042_s13, %s1038_s12 }
   0xe   : > { %p80_p6 = scmp.eq.s32.totalorder %s815_s20, 0  ;;  %p131_p7 = scmp.eq.s32.totalorder %s815_s20, 3 }
   0xf   : > { %s1424_s23 = smov (%p33_p4, %s1422_s23), 0  ;;  %p137_p10 = scmp.eq.s32.totalorder %s816_s21, 3 }
  0x10   : > { %p1157_p8 = por %p80_p6, %p79_p5  ;;  %p1161_p9 = por %p131_p7, %p73_p1 }
  0x11   : > { %s61_s29 = ssub.s32 %s1062_s18, %s1424_s23  ;;  %p1167_p12 = por %p137_p10, %p79_p5 }
  0x12   : > { %s1405_s28 = scalar_select %p1161_p9, 1, 0 }
  0x13   : > { %s63_s30 = sor.u32 %s62_s25, %s61_s29  ;;  %p852_p13 = scmp.lt.s32.totalorder %s1066_s19, 4 }
  0x14   : > { %p64_p11 = scmp.eq.s32.totalorder %s63_s30, 0  ;;  %s164_s5 = sand.u32 1, %s1046_s14  }
  0x15   : > { %s1406_s4 = scalar_select %p1167_p12, 1, 0 }
  0x16   : > { %s1174_s6 = scalar_select %p64_p11, %s1046_s14, %s66_s24  }
  0x17   : > { %s819_s7 = sshll.u32 %s164_s5, 4  ;;  %s820_s8 = sshll.u32 %s1058_s17, 2 }
  0x18   : > { %s821_s9 = sshll.u32 %s1062_s18, 3  ;;  %s168_s10 = scalar_lea.vmem [#allocation2], %s819_s7 }
  0x19   : > { %s178_s11 = sshll.u32 %s168_s10, 4  ;;  %s174_s20 = sadd.s32 %s821_s9, %s820_s8  ;;  %s1178_s11 = int_to_ptr.vmem [resolvable:$true] %s178_s11 }
  0x1a   : > { %s822_s21 = sshll.u32 %s174_s20, 6  ;;  %p1182_p0 = pnand %p852_p13, %p1149_p3 }
  0x1b   : > { %s1189_s24 = scalar_lea.hbm %s1399_s1, %s822_s21  ;;  %s165_s7 = scalar_lea.sflag [#allocation3], %s164_s5 }
  0x1c   : > { %s938_s8 = scalar_lea.hbm %s1189_s24, 256  ;;  %p940_p3 = pneg %p1182_p0 }
  0x1d   : > { %p939_p4 = scmp.ne.s32.totalorder %s1189_s24, %s938_s8  ;;  %s943_s10 = scalar_lea.hbm %s1399_s1, 1024 }
  0x1e   : > { %p944_p7 = scmp.lt.u32.totalorder %s1189_s24, %s1399_s1  ;;  %p945_p10 = scmp.lt.u32.totalorder %s943_s10, %s938_s8 }
  0x1f   : > { %p941_p5 = pnand %p940_p3, %p939_p4  ;;  %p947_p13 = scmp.lt.u32.totalorder %s938_s8, %s1189_s24 }
  0x20   : > { %p946_p11 = por %p945_p10, %p944_p7 }
  0x21   : > { %p942_p6 = pneg %p941_p5 }
  0x22   : > { %p948_p1 = por %p947_p13, %p946_p11 }
  0x24   : > { %p949_p2 = pnand %p948_p1, %p942_p6 }
  0x26   : > { %952 = shalt.err (!%p949_p2)
}
  0x27   : > { %s953_s5 = scalar_lea.vmem %s1178_s11, 256  ;;  %s1068_s29 = smov [#allocation2]  }
  0x28   : > { %p954_p4 = scmp.ne.s32.totalorder %s1178_s11, %s953_s5  ;;  %s958_s30 = sshll.u32 %s1068_s29, 4  ;;  %s959_s30 = int_to_ptr.vmem [resolvable:$false] %s958_s30 }
  0x29   : > { %s960_s26 = scalar_lea.vmem %s959_s30, 512  ;;  %p961_p9 = scmp.lt.s32.totalorder %s1178_s11, %s959_s30 }
  0x2a   : > { %p956_p5 = pnand %p954_p4, %p940_p3  ;;  %p962_p7 = scmp.lt.s32.totalorder %s960_s26, %s953_s5 }
  0x2c   : > { %p957_p12 = pneg %p956_p5  ;;  %p963_p10 = por %p962_p7, %p961_p9 }
  0x2e   : > { %p964_p11 = pnand %p963_p10, %p957_p12 }
  0x30   : > { %967 = shalt.err (!%p964_p11)
}
  0x31   : > { %847 = dma.hbm_to_vmem [thread:$0]  (!%p1182_p0), %s1189_s24, 256, %s1178_s11, %s165_s7  }
  0x32   : > { %p1408_p1 = scmp.lt.s32.totalorder %s1066_s19, 5  ;;  %p1409_p2 = scmp.ge.s32.totalorder %s1066_s19, 1 }
  0x34   : > { %p191_p3 = pnand %p1409_p2, %p1408_p1 }
  0x35   : > { %s1223_s8 = sand.u32 (!%p191_p3), 1, %s1042_s13  }
  0x36   : > { %194 = sbr.rel (%p191_p3) target bundleno = 506 (0x1fa), region = 32  ;;  %s824_s9 = sshll.u32 (!%p191_p3), %s1223_s8, 4 }
  0x37   : > { %s197_s10 = scalar_lea.sflag (!%p191_p3), [#allocation3], %s1223_s8  ;;  %s1229_s25 = scalar_lea.vmem (!%p191_p3), [#allocation2], %s824_s9 }
  0x3d   : > { %1029 = dma.done.wait (%p1157_p8), %s197_s10, 256  }
  0x3e   : > { %1031 = vsyncadd (%p1157_p8), %s197_s10, 4294967040  ;;  %p231_p9 = scmp.lt.s32.totalorder %s1054_s16, 1  ;;  %v1069_v0 = vmov 2   ;;  %v1070_v1 = vmov 3   ;;  %s1071_s5 = smov 2   ;;  %v1072_v3 = vmov 0   ;;  %v252_v11 = vlaneseq }
  0x3f   : > { %924 = vset.pattern.permute.xlu1 %v1069_v0  ;;  %926 = vset.pattern.permute.xlu0 %v1070_v1  ;;  %v1073_v4 = vmov 1   ;;  %s1074_s26 = smov 127   ;;  %v242_v15 = vld [vmem:[%s1229_s25] sm:$0xff]  ;;  %v243_v19 = vld [vmem:[%s1229_s25 + $0x8] sm:$0xff]  ;;  %s835_s10 = sshll.u32 %s1050_s15, 2 }
  0x40   : > { %s232_s11 = scalar_select %p231_p9, %s1054_s16, 1  ;;  %v1244_v12 = vshrl.u32 %v252_v11, 7  ;;  %v453_v32 = vrot.slane %v242_v15, 6  ;;  %v454_v33 = vrot.slane %v243_v19, 6 }
  0x41   : > { %s836_s25 = sshll.u32 %s1054_s16, 3  ;;  %s230_s16 = scalar_lea.vmem [#allocation5], %s824_s9 }
  0x42   : > { %s826_s24 = sshll.u32 %s232_s11, 3  ;;  %v1247_v13 = vsub.s32 2, %v1244_v12  ;;  %v1250_v14 = vsub.s32 6, %v1244_v12  ;;  %v298_v17 = vsub.s32 0, %v1244_v12  ;;  %v302_v18 = vsub.s32 4, %v1244_v12  ;;  %s700_s11 = sadd.s32 %s836_s25, %s835_s10 }
  0x43   : > { %s234_s21 = scalar_lea.vmem %s1398_s0, %s826_s24  ;;  %s239_s30 = scalar_lea.vmem %s1400_s2, %s826_s24  ;;  %v394_v22 = vsub.s32 1, %v1244_v12  ;;  %v398_v23 = vsub.s32 5, %v1244_v12  ;;  %v350_v24 = vsub.s32 3, %v1244_v12  ;;  %v354_v25 = vsub.s32 7, %v1244_v12 }
  0x44   : > { %v241_v2 = vld [vmem:[%s234_s21] sm:$0xff]  ;;  %v255_v20 = vrot.slane %v242_v15, %v1247_v13  ;;  %v259_v21 = vrot.slane %v242_v15, %v1250_v14  ;;  %v263_v26 = vrot.slane %v243_v19, %v1247_v13  ;;  %v267_v27 = vrot.slane %v243_v19, %v1250_v14  ;;  %s837_s15 = sshll.u32 %s700_s11, 6  ;;  %s704_s24 = sshll.u32 %s230_s16, 4  ;;  %s1346_s24 = int_to_ptr.vmem [resolvable:$true] %s704_s24 }
  0x45   : > { %444 = vrot.lane.b32.xlu0 %v241_v2, %s1071_s5  ;;  %247 = vperm.xlu1 %924, %v241_v2   ;;  %v244_v7 = vld [vmem:[%s239_s30] sm:$0xff]  ;;  %v299_v28 = vrot.slane %v242_v15, %v298_v17  ;;  %v303_v29 = vrot.slane %v242_v15, %v302_v18  ;;  %v307_v30 = vrot.slane %v243_v19, %v298_v17  ;;  %s1344_s20 = scalar_lea.hbm %s1401_s3, %s837_s15  ;;  %s688_s21 = scalar_lea.sflag [#allocation4], %s1223_s8 }
  0x46   : > { %v571_v8 = vadd.s32 1, %v244_v7  ;;  %v311_v31 = vrot.slane %v243_v19, %v302_v18  ;;  %v275_v34 = vrot.slane %v255_v20, %v1247_v13  ;;  %v279_v35 = vrot.slane %v259_v21, %v1247_v13  ;;  %s968_s5 = scalar_lea.vmem %s1346_s24, 256  ;;  %p1410_p12 = scmp.ne.s32.totalorder %s1405_s28, 0 }
  0x47   : > { %v395_v37 = vrot.slane %v242_v15, %v394_v22  ;;  %v399_v38 = vrot.slane %v242_v15, %v398_v23  ;;  %v403_v39 = vrot.slane %v243_v19, %v394_v22  ;;  %v407_v40 = vrot.slane %v243_v19, %v398_v23  ;;  %p969_p8 = scmp.ne.s32.totalorder %s1346_s24, %s968_s5  ;;  %s1075_s27 = smov [#allocation5]  }
  0x48   : > { %v351_v41 = vrot.slane %v242_v15, %v350_v24  ;;  %v355_v42 = vrot.slane %v242_v15, %v354_v25  ;;  %v283_v43 = vrot.slane %v263_v26, %v1247_v13  ;;  %v287_v44 = vrot.slane %v267_v27, %v1247_v13  ;;  %s972_s29 = sshll.u32 %s1075_s27, 4  ;;  %s973_s29 = int_to_ptr.vmem [resolvable:$false] %s972_s29 }
  0x49   : > { %925 = vset.pattern.permute.xlu1 %v1072_v3  ;;  %v359_v45 = vrot.slane %v243_v19, %v350_v24  ;;  %v363_v46 = vrot.slane %v243_v19, %v354_v25  ;;  %v319_v47 = vrot.slane %v299_v28, %v298_v17  ;;  %v323_v48 = vrot.slane %v303_v29, %v298_v17  ;;  %p970_p0 = pnand %p969_p8, %p1410_p12  ;;  %s974_s30 = scalar_lea.vmem %s973_s29, 512 }
  0x4a   : > { %293 = vperm.xlu1 %925, %v241_v2   ;;  %v457_v49 = vsub.f32 %v242_v15, %v453_v32  ;;  %v458_v50 = vsub.f32 %v243_v19, %v454_v33  ;;  %v327_v51 = vrot.slane %v307_v30, %v298_v17  ;;  %v331_v52 = vrot.slane %v311_v31, %v298_v17  ;;  %p975_p13 = scmp.lt.s32.totalorder %s1346_s24, %s973_s29  ;;  %p976_p4 = scmp.lt.s32.totalorder %s974_s30, %s968_s5 }
  0x4b   : > { %v415_v53 = vrot.slane %v395_v37, %v394_v22  ;;  %v419_v54 = vrot.slane %v399_v38, %v394_v22  ;;  %v423_v55 = vrot.slane %v403_v39, %v394_v22  ;;  %v427_v56 = vrot.slane %v407_v40, %v394_v22  ;;  %p971_p6 = pneg %p970_p0 }
  0x4c   : > { %v371_v57 = vrot.slane %v351_v41, %v350_v24  ;;  %v375_v58 = vrot.slane %v355_v42, %v350_v24  ;;  %v379_v62 = vrot.slane %v359_v45, %v350_v24  ;;  %v383_v63 = vrot.slane %v363_v46, %v350_v24  ;;  %p977_p5 = por %p976_p4, %p975_p13 }
  0x4e   : > { %927 = vset.pattern.permute.xlu1 %v1073_v4  ;;  %p978_p7 = pnand %p977_p5, %p971_p6 }
  0x4f   : > { %389 = vperm.xlu1 %927, %v241_v2  }
  0x53   : > { %928 = vset.pattern.permute.xlu1 %v1069_v0 }
  0xb7   : > { %v445_v5 = vpop.permute.xlu0 %444 }
  0xb8   : > { %v447_v6 = vsub.f32 %v241_v2, %v445_v5  ;;  %v829_v5 = vrot.slane %v458_v50, 9 }
  0xba   : > { %449 = vrot.lane.b32.xlu0 %v447_v6, %s1074_s26  ;;  %v468_v23 = vmul.f32 %v829_v5, %v458_v50 }
  0xbc   : > { %v487_v33 = vrot.slane %v468_v23, %v1247_v13 }
  0xbe   : > { %345 = vperm.xlu0 %926, %v241_v2   ;;  %v507_v45 = vrot.slane %v487_v33, %v1247_v13  ;;  %v570_v33 = vshll.u32 %v1244_v12, 5 }
  0xc2   : > { %929 = vset.pattern.permute.xlu0 %v1072_v3  ;;  %v828_v3 = vrot.slane %v457_v49, 9 }
  0xc3   : > { %573 = vperm.xlu0 %929, %v571_v8  }
  0xc4   : > { %v1253_v16 = vpop.permute.xlu1 %247  ;;  %v467_v22 = vmul.f32 %v828_v3, %v457_v49 }
  0xc5   : > { %v288_v59 = vmin.f32 %v1253_v16, %v275_v34  ;;  %v289_v60 = vmin.f32 %v1253_v16, %v279_v35  ;;  %v290_v0 = vmin.f32 %v1253_v16, %v283_v43  ;;  %v291_v1 = vmin.f32 %v1253_v16, %v287_v44 }
  0xc6   : > { %v479_v31 = vrot.slane %v467_v22, %v1247_v13  ;;  %v483_v32 = vrot.slane %v467_v22, %v1250_v14  ;;  %v491_v34 = vrot.slane %v468_v23, %v1250_v14 }
  0xc8   : > { %v499_v43 = vrot.slane %v479_v31, %v1247_v13  ;;  %v503_v44 = vrot.slane %v483_v32, %v1247_v13  ;;  %v511_v46 = vrot.slane %v491_v34, %v1247_v13 }
  0xc9   : > { %v294_v36 = vpop.permute.xlu1 %293 }
  0xca   : > { %v333_v7 = vmax.f32 %v294_v36, %v323_v48  ;;  %v334_v8 = vmax.f32 %v294_v36, %v327_v51 }
  0xcc   : > { %v337_v25 = vsub.f32 %v289_v60, %v333_v7  ;;  %v338_v16 = vsub.f32 %v290_v0, %v334_v8 }
  0xce   : > { %v390_v61 = vpop.permute.xlu1 %389  ;;  %v342_v37 = vmax.f32 %v338_v16, 0.0 }
  0xcf   : > { %v429_v11 = vmax.f32 %v390_v61, %v419_v54  ;;  %v430_v15 = vmax.f32 %v390_v61, %v423_v55  ;;  %v431_v17 = vmax.f32 %v390_v61, %v427_v56 }
 0x12c   : > { %v450_v9 = vpop.permute.xlu0 %449 }
 0x12d   : > { %v452_v10 = vmul.f32 %v450_v9, %v447_v6  ;;  %v332_v6 = vmax.f32 %v294_v36, %v319_v47  ;;  %v335_v9 = vmax.f32 %v294_v36, %v331_v52  ;;  %v341_v36 = vmax.f32 %v337_v25, 0.0 }
 0x12f   : > { %471 = vperm.xlu1 %928, %v452_v10   ;;  %v428_v10 = vmax.f32 %v390_v61, %v415_v53  ;;  %v336_v24 = vsub.f32 %v288_v59, %v332_v6  ;;  %v339_v26 = vsub.f32 %v291_v1, %v335_v9 }
 0x131   : > { %v340_v35 = vmax.f32 %v336_v24, 0.0  ;;  %v343_v38 = vmax.f32 %v339_v26, 0.0 }
 0x13d   : > { %v346_v2 = vpop.permute.xlu0 %345 }
 0x13e   : > { %v384_v18 = vmin.f32 %v346_v2, %v371_v57  ;;  %v385_v19 = vmin.f32 %v346_v2, %v375_v58  ;;  %v386_v20 = vmin.f32 %v346_v2, %v379_v62  ;;  %v387_v21 = vmin.f32 %v346_v2, %v383_v63 }
 0x140   : > { %v432_v27 = vsub.f32 %v384_v18, %v428_v10  ;;  %v433_v28 = vsub.f32 %v385_v19, %v429_v11  ;;  %v434_v29 = vsub.f32 %v386_v20, %v430_v15  ;;  %v435_v30 = vsub.f32 %v387_v21, %v431_v17 }
 0x142   : > { %v436_v39 = vmax.f32 %v432_v27, 0.0  ;;  %v437_v40 = vmax.f32 %v433_v28, 0.0  ;;  %v438_v41 = vmax.f32 %v434_v29, 0.0  ;;  %v439_v42 = vmax.f32 %v435_v30, 0.0 }
 0x144   : > { %v440_v48 = vmul.f32 %v436_v39, %v340_v35  ;;  %v441_v49 = vmul.f32 %v437_v40, %v341_v36  ;;  %v442_v14 = vmul.f32 %v438_v41, %v342_v37  ;;  %v443_v50 = vmul.f32 %v439_v42, %v343_v38  ;;  %v574_v37 = vpop.permute.xlu0 %573 }
 0x145   : > { %v575_v40 = vor.u32 %v574_v37, %v570_v33 }
 0x146   : > { %vm528_vm4 = vcmp.gt.f32.partialorder %v440_v48, 0.0  ;;  %vm529_vm5 = vcmp.gt.f32.partialorder %v441_v49, 0.0  ;;  %vm530_vm6 = vcmp.gt.f32.partialorder %v442_v14, 0.0  ;;  %vm531_vm7 = vcmp.gt.f32.partialorder %v443_v50, 0.0 }
 0x1ae   : > { %v472_v47 = vpop.permute.xlu1 %471 }
 0x1af   : > { %v512_v51 = vadd.f32 %v499_v43, %v472_v47  ;;  %v513_v52 = vadd.f32 %v503_v44, %v472_v47  ;;  %v514_v53 = vadd.f32 %v507_v45, %v472_v47  ;;  %v515_v54 = vadd.f32 %v511_v46, %v472_v47 }
 0x1b1   : > { %v516_v55 = vsub.f32 %v512_v51, %v440_v48  ;;  %v517_v56 = vsub.f32 %v513_v52, %v441_v49  ;;  %v518_v57 = vsub.f32 %v514_v53, %v442_v14  ;;  %v519_v58 = vsub.f32 %v515_v54, %v443_v50 }
 0x1b3   : > { %vm520_vm0 = vcmp.gt.f32.partialorder %v516_v55, 0.0  ;;  %vm521_vm1 = vcmp.gt.f32.partialorder %v517_v56, 0.0  ;;  %vm522_vm2 = vcmp.gt.f32.partialorder %v518_v57, 0.0  ;;  %vm523_vm3 = vcmp.gt.f32.partialorder %v519_v58, 0.0 }
 0x1b4   : > { %v524_v59 = vsel %vm520_vm0, %v516_v55, 1.0  ;;  %v525_v60 = vsel %vm521_vm1, %v517_v56, 1.0  ;;  %v526_v13 = vsel %vm522_vm2, %v518_v57, 1.0  ;;  %v527_v61 = vsel %vm523_vm3, %v519_v58, 1.0 }
 0x1b5   : > { %930 = vrcp.f32 %v524_v59 }
 0x1b6   : > { %932 = vrcp.f32 %v525_v60 }
 0x1b7   : > { %934 = vrcp.f32 %v526_v13 }
 0x1b8   : > { %936 = vrcp.f32 %v527_v61 }
 0x1bf   : > { %v931_v62 = vpop.eup %930 }
 0x1c0   : > { %v933_v63 = vpop.eup %932  ;;  %v533_v0 = vmul.f32 %v931_v62, %v440_v48 }
 0x1c1   : > { %v935_v1 = vpop.eup %934  ;;  %v535_v2 = vmul.f32 %v933_v63, %v441_v49 }
 0x1c2   : > { %v937_v3 = vpop.eup %936  ;;  %v537_v5 = vmul.f32 %v935_v1, %v442_v14  ;;  %v540_v6 = vsel %vm528_vm4, %v533_v0, 0.0 }
 0x1c3   : > { %v539_v7 = vmul.f32 %v937_v3, %v443_v50  ;;  %v541_v8 = vsel %vm529_vm5, %v535_v2, 0.0  ;;  %v544_v9 = vrot.slane %v540_v6, 4 }
 0x1c4   : > { %v542_v10 = vsel %vm530_vm6, %v537_v5, 0.0  ;;  %v550_v11 = vrot.slane %v541_v8, 4 }
 0x1c5   : > { %v543_v15 = vsel %vm531_vm7, %v539_v7, 0.0  ;;  %v545_v17 = vmax.f32 %v540_v6, %v544_v9  ;;  %v556_v18 = vrot.slane %v542_v10, 4 }
 0x1c6   : > { %v551_v19 = vmax.f32 %v541_v8, %v550_v11  ;;  %v562_v20 = vrot.slane %v543_v15, 4 }
 0x1c7   : > { %v546_v21 = vrot.slane %v545_v17, 2  ;;  %v557_v22 = vmax.f32 %v542_v10, %v556_v18 }
 0x1c8   : > { %v552_v23 = vrot.slane %v551_v19, 2  ;;  %v563_v24 = vmax.f32 %v543_v15, %v562_v20 }
 0x1c9   : > { %v547_v25 = vmax.f32 %v545_v17, %v546_v21  ;;  %v558_v16 = vrot.slane %v557_v22, 2 }
 0x1ca   : > { %v553_v26 = vmax.f32 %v551_v19, %v552_v23  ;;  %v564_v27 = vrot.slane %v563_v24, 2 }
 0x1cb   : > { %v548_v28 = vrot.slane %v547_v25, 1  ;;  %v559_v29 = vmax.f32 %v557_v22, %v558_v16 }
 0x1cc   : > { %v554_v30 = vrot.slane %v553_v26, 1  ;;  %v565_v31 = vmax.f32 %v563_v24, %v564_v27 }
 0x1cd   : > { %v560_v32 = vrot.slane %v559_v29, 1  ;;  %v1283_v34 = vmax.f32 %v547_v25, %v548_v28 }
 0x1ce   : > { %v1285_v35 = vmax.f32 %v553_v26, %v554_v30  ;;  %v566_v36 = vrot.slane %v565_v31, 1 }
 0x1cf   : > { %v1287_v38 = vmax.f32 %v559_v29, %v560_v32  ;;  %vm576_vm8 = vcmp.eq.f32.partialorder %v540_v6, %v1283_v34  ;;  %vm636_vm10 = vcmp.lt.f32.partialorder %v1283_v34, 0.5  ;;  %vm632_vm13 = vcmp.lt.f32.partialorder %v1283_v34, 0.3 }
 0x1d0   : > { %v1289_v39 = vmax.f32 %v565_v31, %v566_v36  ;;  %vm577_vm9 = vcmp.eq.f32.partialorder %v541_v8, %v1285_v35  ;;  %vm633_vm14 = vcmp.lt.f32.partialorder %v1285_v35, 0.3  ;;  %vm637_vm0 = vcmp.lt.f32.partialorder %v1285_v35, 0.5 }
 0x1d1   : > { %vm578_vm11 = vcmp.eq.f32.partialorder %v542_v10, %v1287_v38  ;;  %vm634_vm15 = vcmp.lt.f32.partialorder %v1287_v38, 0.3  ;;  %vm638_vm1 = vcmp.lt.f32.partialorder %v1287_v38, 0.5  ;;  %v640_v12 = vsel %vm636_vm10, 4294967295, %v1073_v4 }
 0x1d2   : > { %vm579_vm12 = vcmp.eq.f32.partialorder %v543_v15, %v1289_v39  ;;  %vm639_vm2 = vcmp.lt.f32.partialorder %v1289_v39, 0.5  ;;  %v580_v41 = vsel %vm576_vm8, %v575_v40, 256  ;;  %v581_v42 = vsel %vm577_vm9, %v575_v40, 256 }
 0x1d3   : > { %v582_v43 = vsel %vm578_vm11, %v575_v40, 256  ;;  %v583_v44 = vsel %vm579_vm12, %v575_v40, 256  ;;  %v584_v45 = vrot.slane %v580_v41, 4  ;;  %v593_v46 = vrot.slane %v581_v42, 4 }
 0x1d4   : > { %vm635_vm3 = vcmp.lt.f32.partialorder %v1289_v39, 0.3  ;;  %v641_v47 = vsel %vm637_vm0, 4294967295, %v1073_v4  ;;  %v602_v48 = vrot.slane %v582_v43, 4  ;;  %v611_v49 = vrot.slane %v583_v44, 4 }
 0x1d5   : > { %v642_v14 = vsel %vm638_vm1, 4294967295, %v1073_v4  ;;  %v643_v50 = vsel %vm639_vm2, 4294967295, %v1073_v4  ;;  %vm585_vm4 = vcmp.lt.s32.totalorder %v580_v41, %v584_v45  ;;  %vm594_vm5 = vcmp.lt.s32.totalorder %v581_v42, %v593_v46 }
 0x1d6   : > { %v586_v51 = vsel %vm585_vm4, %v580_v41, %v584_v45  ;;  %v595_v52 = vsel %vm594_vm5, %v581_v42, %v593_v46  ;;  %vm603_vm6 = vcmp.lt.s32.totalorder %v582_v43, %v602_v48  ;;  %vm612_vm7 = vcmp.lt.s32.totalorder %v583_v44, %v611_v49 }
 0x1d7   : > { %v587_v53 = vrot.slane %v586_v51, 2  ;;  %v596_v54 = vrot.slane %v595_v52, 2  ;;  %v604_v55 = vsel %vm603_vm6, %v582_v43, %v602_v48  ;;  %v613_v56 = vsel %vm612_vm7, %v583_v44, %v611_v49 }
 0x1d8   : > { %v644_v57 = vsel %vm632_vm13, 0, %v640_v12  ;;  %v645_v58 = vsel %vm633_vm14, 0, %v641_v47  ;;  %v605_v59 = vrot.slane %v604_v55, 2  ;;  %v614_v60 = vrot.slane %v613_v56, 2 }
 0x1d9   : > { %vm668_vm8 = vcmask 1040384   ;;  %v646_v4 = vsel %vm634_vm15, 0, %v642_v14  ;;  %v647_v13 = vsel %vm635_vm3, 0, %v643_v50  ;;  %vm588_vm9 = vcmp.lt.s32.totalorder %v586_v51, %v587_v53 }
 0x1da   : > { %vm597_vm10 = vcmp.lt.s32.totalorder %v595_v52, %v596_v54  ;;  %v589_v61 = vsel %vm588_vm9, %v586_v51, %v587_v53  ;;  %vm606_vm11 = vcmp.lt.s32.totalorder %v604_v55, %v605_v59  ;;  %vm615_vm12 = vcmp.lt.s32.totalorder %v613_v56, %v614_v60 }
 0x1db   : > { %v598_v62 = vsel %vm597_vm10, %v595_v52, %v596_v54  ;;  %v590_v63 = vrot.slane %v589_v61, 1  ;;  %v607_v1 = vsel %vm606_vm11, %v604_v55, %v605_v59  ;;  %v616_v2 = vsel %vm615_vm12, %v613_v56, %v614_v60 }
 0x1dc   : > { %v599_v0 = vrot.slane %v598_v62, 1  ;;  %vm673_vm13 = vcmask 1041408   ;;  %vm648_vm14 = vcmp.eq.s32.totalorder %v644_v57, 0  ;;  %vm649_vm0 = vcmp.eq.s32.totalorder %v645_v58, 0 }
 0x1dd   : > { %v608_v3 = vrot.slane %v607_v1, 1  ;;  %v617_v5 = vrot.slane %v616_v2, 1  ;;  %vm678_vm1 = vcmask 1042432   ;;  %vm650_vm15 = vcmp.eq.s32.totalorder %v646_v4, 0 }
 0x1de   : > { %vm651_vm2 = vcmp.eq.s32.totalorder %v647_v13, 0  ;;  %vm591_vm3 = vcmp.lt.s32.totalorder %v589_v61, %v590_v63  ;;  %vm600_vm4 = vcmp.lt.s32.totalorder %v598_v62, %v599_v0  ;;  %vm656_vm7 = vcmp.eq.s32.totalorder %v644_v57, 4294967295 }
 0x1df   : > { %v592_v6 = vsel %vm591_vm3, %v589_v61, %v590_v63  ;;  %v601_v7 = vsel %vm600_vm4, %v598_v62, %v599_v0  ;;  %vm609_vm5 = vcmp.lt.s32.totalorder %v607_v1, %v608_v3  ;;  %vm618_vm6 = vcmp.lt.s32.totalorder %v616_v2, %v617_v5 }
 0x1e0   : > { %v610_v8 = vsel %vm609_vm5, %v607_v1, %v608_v3  ;;  %v619_v9 = vsel %vm618_vm6, %v616_v2, %v617_v5  ;;  %v620_v10 = vshra.s32 %v592_v6, 5  ;;  %v621_v11 = vshra.s32 %v601_v7, 5 }
 0x1e1   : > { %v622_v15 = vshra.s32 %v610_v8, 5  ;;  %v623_v17 = vshra.s32 %v619_v9, 5  ;;  %v624_v18 = vand.u32 31, %v592_v6  ;;  %v625_v19 = vand.u32 31, %v601_v7 }
 0x1e2   : > { %v626_v20 = vand.u32 31, %v610_v8  ;;  %v627_v21 = vand.u32 31, %v619_v9  ;;  %vm657_vm9 = vcmp.eq.s32.totalorder %v645_v58, 4294967295  ;;  %vm658_vm10 = vcmp.eq.s32.totalorder %v646_v4, 4294967295 }
 0x1e3   : > { %v830_v22 = vadd.s32 4294967295, %v624_v18  ;;  %v831_v23 = vadd.s32 4294967295, %v625_v19  ;;  %vm659_vm11 = vcmp.eq.s32.totalorder %v647_v13, 4294967295  ;;  %v669_v16 = vsel %vm668_vm8, %v620_v10, %v644_v57 }
 0x1e4   : > { %v832_v24 = vadd.s32 4294967295, %v626_v20  ;;  %v833_v25 = vadd.s32 4294967295, %v627_v21  ;;  %v670_v26 = vsel %vm668_vm8, %v621_v11, %v645_v58  ;;  %v671_v29 = vsel %vm668_vm8, %v622_v15, %v646_v4 }
 0x1e5   : > { %v652_v27 = vsel %vm648_vm14, 16, %v830_v22  ;;  %v653_v28 = vsel %vm649_vm0, 16, %v831_v23  ;;  %v672_v30 = vsel %vm668_vm8, %v623_v17, %v647_v13 }
 0x1e6   : > { %v654_v31 = vsel %vm650_vm15, 16, %v832_v24  ;;  %v655_v32 = vsel %vm651_vm2, 16, %v833_v25  ;;  %v660_v33 = vsel %vm656_vm7, 4294967295, %v652_v27  ;;  %v661_v36 = vsel %vm657_vm9, 4294967295, %v653_v28 }
 0x1e7   : > { %v662_v37 = vsel %vm658_vm10, 4294967295, %v654_v31  ;;  %v663_v40 = vsel %vm659_vm11, 4294967295, %v655_v32  ;;  %v674_v12 = vsel %vm673_vm13, %v669_v16, %v660_v33  ;;  %v675_v41 = vsel %vm673_vm13, %v670_v26, %v661_v36 }
 0x1e8   : > { %v676_v42 = vsel %vm673_vm13, %v671_v29, %v662_v37  ;;  %v677_v43 = vsel %vm673_vm13, %v672_v30, %v663_v40  ;;  %v679_v44 = vsel %vm678_vm1, %v674_v12, %v1283_v34  ;;  %v680_v45 = vsel %vm678_vm1, %v675_v41, %v1285_v35 }
 0x1e9   : > { %v681_v46 = vsel %vm678_vm1, %v676_v42, %v1287_v38  ;;  %v682_v47 = vsel %vm678_vm1, %v677_v43, %v1289_v39  ;;  %v683_v48 = vcombine.low %v679_v44, %v680_v45 }
 0x1ea   : > { %v684_v49 = vcombine.low %v681_v46, %v682_v47 }
 0x1eb   : > { %685 = vst [vmem:[%s230_s16] sm:$0xff] %v683_v48 }
 0x1ec   : > { %686 = vst [vmem:[%s230_s16 + $0x8] sm:$0xff] %v684_v49 }
 0x1ed   : > { %981 = shalt.err (!%p978_p7)
}
 0x1ee   : > { %s982_s8 = scalar_lea.hbm %s1344_s20, 256  ;;  %s986_s25 = scalar_lea.hbm %s1401_s3, 1024 }
 0x1ef   : > { %p983_p10 = scmp.ne.s32.totalorder %s1344_s20, %s982_s8  ;;  %p987_p2 = scmp.lt.u32.totalorder %s1344_s20, %s1401_s3 }
 0x1f0   : > { %p988_p3 = scmp.lt.u32.totalorder %s986_s25, %s982_s8  ;;  %p990_p8 = scmp.lt.u32.totalorder %s982_s8, %s1344_s20 }
 0x1f1   : > { %p984_p11 = pnand %p983_p10, %p1410_p12 }
 0x1f2   : > { %p989_p9 = por %p988_p3, %p987_p2 }
 0x1f3   : > { %p985_p1 = pneg %p984_p11 }
 0x1f4   : > { %p991_p0 = por %p990_p8, %p989_p9 }
 0x1f6   : > { %p992_p6 = pnand %p991_p0, %p985_p1 }
 0x1f8   : > { %995 = shalt.err (!%p992_p6)
}
 0x1f9   : > { %842 = dma.vmem_to_hbm [thread:$0]  (%p1410_p12), %s1346_s24, 256, %s1344_s20, %s688_s21  }
 0x1fa PF: > { %p853_p13 = scmp.ge.s32.totalorder %s1066_s19, 2  ;;  %s716_s16 = sand.u32 1, %s1038_s12  }
 0x1fb   : > { %p1411_p4 = scmp.ne.s32.totalorder %s1406_s4, 0  ;;  %s717_s9 = scalar_lea.sflag [#allocation4], %s716_s16 }
 0x1fd   : > { %p849_p5 = pnand %p853_p13, %p1411_p4 }
 0x1ff   : > { %1033 = dma.done.wait (!%p849_p5), %s717_s9, 256  }
 0x200   : > { %1035 = vsyncadd (!%p849_p5), %s717_s9, 4294967040  ;;  %s19_s19 = sadd.s32 1, %s1066_s19   ;;  %s1412_s12 = smov %s1042_s13 }
 0x201   : > { %p16_p7 = scmp.ge.s32.totalorder %s19_s19, 6   ;;  %s1413_s13 = smov %s1046_s14 }
 0x202   : > { %s1414_s14 = smov %s1174_s6  ;;  %s1415_s15 = smov %s1058_s17 }
 0x203   : > { %s1416_s16 = smov %s1062_s18  ;;  %s1417_s17 = smov %s1420_s22 }
 0x204   : > { %s1418_s18 = smov %s1424_s23  ;;  %18 = sbr.rel (!%p16_p7) target bundleno = 7 (0x7), region = 83 }
 0x20b   :  { %722 = vsyncpa [#allocation3], 1 }
 0x20c   :  { %724 = vsyncpa [#allocation3 + $0x1], 1 }
 0x20d   :  { %725 = vsyncpa [#allocation4], 1 }
 0x20e   :  { %727 = vsyncpa [#allocation4 + $0x1], 1 }

</bundles_post_ra>
